<compile_context>
chip_gen: v7x
topology: tpu7x:2x2x1
jax: 0.10.0
libtpu: 0.0.40
codegen_flags: <defaults>
</compile_context>

<pallas_src>
import functools

import jax
import jax.numpy as jnp
from jax.experimental import pallas as pl
from jax.experimental.pallas import tpu as pltpu


def _rie_kernel(x_ref, out_ref, dir_ref, *, n_orient):
    x = x_ref[...]                                         # (O, T) input dtype

    # --- main direction: first-occurrence argmax over orientation (sublanes).
    # Compare in f32 (v5e has no bf16 VALU path; exact-equality compare vs max
    # is dtype-preserving under the widening cast).
    xf = x.astype(jnp.float32)
    mx = jnp.max(xf, axis=0, keepdims=True)                # (1, T)
    row = jax.lax.broadcasted_iota(jnp.int32, x.shape, 0)  # (O, T) row index
    d = jnp.min(jnp.where(xf == mx, row, n_orient),
                axis=0, keepdims=True)                     # (1, T) int32

    # --- align: out[a, m] = x[(a + d[m]) % O, m] ---------------------------
    # Select chain: start from x (covers d == 0 and NaN passthrough), then
    # overwrite columns whose direction is s with the rolled copy.
    out = x
    for s in range(1, n_orient):                           # static, O is small
        # rolled[a, m] = x[(a + s) % O, m]   (roll shift = O - s)
        rolled = pltpu.roll(x, shift=n_orient - s, axis=0)
        out = jnp.where(d == s, rolled, out)

    out_ref[...] = out
    dir_ref[...] = d


def _round_up(v, m):
    return ((v + m - 1) // m) * m


def rotation_invariant_encoding(x, n_orientation, return_direction=False):
    """JAX/Pallas equivalent of RotationInvariantEncoding.forward."""
    N, C, H, W = x.shape
    assert H == 1 and W == 1, "RIE expects 1x1 spatial input (post global pooling)"
    assert C % n_orientation == 0
    n_feature = C // n_orientation
    M = N * n_feature

    # Lane tiling: lane-dense tiles (multiple of 128), capped at 4096 lanes so
    # per-step VMEM (O x TILE x 2 buffers x in+out) stays far under the 64 MiB
    # physical VMEM of v7x while still amortizing the ~0.35 us/step overhead.
    m128 = _round_up(M, 128)
    tile = min(4096, m128)
    m_pad = _round_up(M, tile)
    grid = (m_pad // tile,)

    # (N, C, 1, 1) -> (N*F, O) -> (O, N*F), padded to lane-dense width.
    # allow_input_fusion below lets XLA fuse this transpose into the input DMA.
    xt = jnp.transpose(x.reshape(M, n_orientation))        # (O, M)
    if m_pad != M:
        xt = jnp.pad(xt, ((0, 0), (0, m_pad - M)))

    kernel = functools.partial(_rie_kernel, n_orient=n_orientation)
    out_t, d = pl.pallas_call(
        kernel,
        grid=grid,
        in_specs=[pl.BlockSpec((n_orientation, tile), lambda i: (0, i))],
        out_specs=(
            pl.BlockSpec((n_orientation, tile), lambda i: (0, i)),
            pl.BlockSpec((1, tile), lambda i: (0, i)),
        ),
        out_shape=(
            jax.ShapeDtypeStruct((n_orientation, m_pad), x.dtype),
            jax.ShapeDtypeStruct((1, m_pad), jnp.int32),
        ),
        compiler_params=pltpu.CompilerParams(
            dimension_semantics=("parallel",),   # shard M across TCs (v7x megacore)
            allow_input_fusion=[True],           # fuse wrapper transpose into input DMA
        ),
    )(xt)

    out_t = out_t[:, :M]
    d = d[:, :M]
    # TODO(synk): downstream consumers could take the (O, M) layout directly and
    # skip this output transpose (another full HBM pass for a mem-bound op).
    output = jnp.transpose(out_t).reshape(N, C, 1, 1)
    main_direction = d.reshape(N, n_feature).astype(jnp.uint8)  # torch uses uint8
    if return_direction:
        return output, main_direction
    return output


class RotationInvariantEncoding:
    """Mirror of the PyTorch module (no learnable parameters)."""

    def __init__(self, nOrientation, return_direction=False):
        self.nOrientation = nOrientation
        self.return_direction = return_direction

    def __call__(self, x):
        return rotation_invariant_encoding(x, self.nOrientation, self.return_direction)


def _rie_reference(x, n_orientation):
    """Pure-JAX reference for validation."""
    N, C, _, _ = x.shape
    F = C // n_orientation
    x3 = x.reshape(N, F, n_orientation)
    d = jnp.argmax(x3, axis=-1)                              # first-occurrence argmax
    idx = (jnp.arange(n_orientation)[None, None, :] + d[..., None]) % n_orientation
    out = jnp.take_along_axis(x3, idx, axis=-1)
    return out.reshape(N, C, 1, 1), d.astype(jnp.uint8)


def _check(N, n_orientation, n_feature, key, quantize=False):
    C = n_orientation * n_feature
    x = jax.random.normal(key, (N, C, 1, 1), dtype=jnp.float32)
    if quantize:
        # Force ties to exercise first-occurrence argmax behavior.
        x = jnp.round(x * 2.0) / 2.0

    module = RotationInvariantEncoding(n_orientation, return_direction=True)
    out, main_dir = module(x)
    out = jax.block_until_ready(out)
    main_dir = jax.block_until_ready(main_dir)

    out_ref, dir_ref = _rie_reference(x, n_orientation)

    assert out.shape == (N, C, 1, 1) and out.dtype == x.dtype
    assert main_dir.shape == (N, n_feature) and main_dir.dtype == jnp.uint8
    assert jnp.allclose(out, out_ref, atol=1e-6, rtol=1e-6)
    assert jnp.array_equal(main_dir, dir_ref)


if __name__ == "__main__":
    key = jax.random.PRNGKey(0)
    k1, k2 = jax.random.split(key)

    # Small canonical case: N=2, 8 orientations, 16 features -> C=128.
    _check(N=2, n_orientation=8, n_feature=16, key=k1)
    # Non-multiple-of-128 lane count (M=36) with ties -> exercises padding path.
    _check(N=3, n_orientation=8, n_feature=12, key=k2, quantize=True)

    print("KERNEL_OK")
</pallas_src>

<mosaic_0001>
module attributes {stable_mosaic.version = 11 : i64} {
  func.func @_rie_kernel(%arg0: i32, %arg1: memref<8x128xf32, #tpu.memory_space<vmem>>, %arg2: memref<8x128xf32, #tpu.memory_space<vmem>>, %arg3: memref<1x128xi32, #tpu.memory_space<vmem>>) attributes {dimension_semantics = [#tpu.dimension_semantics<parallel>], iteration_bounds = array<i64: 1>, scalar_prefetch = 0 : i64, scratch_operands = 0 : i64, tpu.core_type = #tpu.core_type<tc>, window_params = [{transform_indices = @transform_0, window_bounds = array<i64: 8, 128>}, {transform_indices = @transform_1, window_bounds = array<i64: 8, 128>}, {transform_indices = @transform_2, window_bounds = array<i64: 1, 128>}]} {
    %c0 = arith.constant 0 : index
    %c0_0 = arith.constant 0 : index
    %0 = vector.load %arg1[%c0, %c0_0] : memref<8x128xf32, #tpu.memory_space<vmem>>, vector<8x128xf32>
    %cst = arith.constant dense<0xFF800000> : vector<128xf32>
    %1 = vector.multi_reduction <maximumf>, %0, %cst [0] : vector<8x128xf32> to vector<128xf32>
    %2 = vector.shape_cast %1 : vector<128xf32> to vector<1x128xf32>
    %3 = tpu.iota {dimensions = array<i32: 0>} : vector<8x128xi32>
    %4 = vector.broadcast %2 : vector<1x128xf32> to vector<8x128xf32>
    %5 = arith.cmpf oeq, %0, %4 : vector<8x128xf32>
    %c8_i32 = arith.constant 8 : i32
    %6 = vector.broadcast %c8_i32 : i32 to vector<8x128xi32>
    %7 = arith.select %5, %3, %6 : vector<8x128xi1>, vector<8x128xi32>
    %cst_1 = arith.constant dense<2147483647> : vector<128xi32>
    %8 = vector.multi_reduction <minsi>, %7, %cst_1 [0] : vector<8x128xi32> to vector<128xi32>
    %9 = vector.shape_cast %8 : vector<128xi32> to vector<1x128xi32>
    %c7_i32 = arith.constant 7 : i32
    %10 = tpu.dynamic_rotate %0 by %c7_i32 dim 0 : vector<8x128xf32>, i32 -> vector<8x128xf32>
    %c1_i32 = arith.constant 1 : i32
    %11 = vector.broadcast %c1_i32 : i32 to vector<1x128xi32>
    %12 = arith.cmpi eq, %9, %11 : vector<1x128xi32>
    %13 = vector.shape_cast %12 : vector<1x128xi1> to vector<1x128xi1>
    %14 = vector.broadcast %13 : vector<1x128xi1> to vector<8x128xi1>
    %15 = arith.select %14, %10, %0 : vector<8x128xi1>, vector<8x128xf32>
    %c6_i32 = arith.constant 6 : i32
    %16 = tpu.dynamic_rotate %0 by %c6_i32 dim 0 : vector<8x128xf32>, i32 -> vector<8x128xf32>
    %c2_i32 = arith.constant 2 : i32
    %17 = vector.broadcast %c2_i32 : i32 to vector<1x128xi32>
    %18 = arith.cmpi eq, %9, %17 : vector<1x128xi32>
    %19 = vector.shape_cast %18 : vector<1x128xi1> to vector<1x128xi1>
    %20 = vector.broadcast %19 : vector<1x128xi1> to vector<8x128xi1>
    %21 = arith.select %20, %16, %15 : vector<8x128xi1>, vector<8x128xf32>
    %c5_i32 = arith.constant 5 : i32
    %22 = tpu.dynamic_rotate %0 by %c5_i32 dim 0 : vector<8x128xf32>, i32 -> vector<8x128xf32>
    %c3_i32 = arith.constant 3 : i32
    %23 = vector.broadcast %c3_i32 : i32 to vector<1x128xi32>
    %24 = arith.cmpi eq, %9, %23 : vector<1x128xi32>
    %25 = vector.shape_cast %24 : vector<1x128xi1> to vector<1x128xi1>
    %26 = vector.broadcast %25 : vector<1x128xi1> to vector<8x128xi1>
    %27 = arith.select %26, %22, %21 : vector<8x128xi1>, vector<8x128xf32>
    %c4_i32 = arith.constant 4 : i32
    %28 = tpu.dynamic_rotate %0 by %c4_i32 dim 0 : vector<8x128xf32>, i32 -> vector<8x128xf32>
    %c4_i32_2 = arith.constant 4 : i32
    %29 = vector.broadcast %c4_i32_2 : i32 to vector<1x128xi32>
    %30 = arith.cmpi eq, %9, %29 : vector<1x128xi32>
    %31 = vector.shape_cast %30 : vector<1x128xi1> to vector<1x128xi1>
    %32 = vector.broadcast %31 : vector<1x128xi1> to vector<8x128xi1>
    %33 = arith.select %32, %28, %27 : vector<8x128xi1>, vector<8x128xf32>
    %c3_i32_3 = arith.constant 3 : i32
    %34 = tpu.dynamic_rotate %0 by %c3_i32_3 dim 0 : vector<8x128xf32>, i32 -> vector<8x128xf32>
    %c5_i32_4 = arith.constant 5 : i32
    %35 = vector.broadcast %c5_i32_4 : i32 to vector<1x128xi32>
    %36 = arith.cmpi eq, %9, %35 : vector<1x128xi32>
    %37 = vector.shape_cast %36 : vector<1x128xi1> to vector<1x128xi1>
    %38 = vector.broadcast %37 : vector<1x128xi1> to vector<8x128xi1>
    %39 = arith.select %38, %34, %33 : vector<8x128xi1>, vector<8x128xf32>
    %c2_i32_5 = arith.constant 2 : i32
    %40 = tpu.dynamic_rotate %0 by %c2_i32_5 dim 0 : vector<8x128xf32>, i32 -> vector<8x128xf32>
    %c6_i32_6 = arith.constant 6 : i32
    %41 = vector.broadcast %c6_i32_6 : i32 to vector<1x128xi32>
    %42 = arith.cmpi eq, %9, %41 : vector<1x128xi32>
    %43 = vector.shape_cast %42 : vector<1x128xi1> to vector<1x128xi1>
    %44 = vector.broadcast %43 : vector<1x128xi1> to vector<8x128xi1>
    %45 = arith.select %44, %40, %39 : vector<8x128xi1>, vector<8x128xf32>
    %c1_i32_7 = arith.constant 1 : i32
    %46 = tpu.dynamic_rotate %0 by %c1_i32_7 dim 0 : vector<8x128xf32>, i32 -> vector<8x128xf32>
    %c7_i32_8 = arith.constant 7 : i32
    %47 = vector.broadcast %c7_i32_8 : i32 to vector<1x128xi32>
    %48 = arith.cmpi eq, %9, %47 : vector<1x128xi32>
    %49 = vector.shape_cast %48 : vector<1x128xi1> to vector<1x128xi1>
    %50 = vector.broadcast %49 : vector<1x128xi1> to vector<8x128xi1>
    %51 = arith.select %50, %46, %45 : vector<8x128xi1>, vector<8x128xf32>
    %c0_9 = arith.constant 0 : index
    %c0_10 = arith.constant 0 : index
    %52 = vector.load %arg2[%c0_9, %c0_10] : memref<8x128xf32, #tpu.memory_space<vmem>>, vector<8x128xf32>
    tpu.vector_store %arg2[%c0_9, %c0_10], %51 {strides = array<i32>} : memref<8x128xf32, #tpu.memory_space<vmem>>, vector<8x128xf32>,
    %c0_11 = arith.constant 0 : index
    %c0_12 = arith.constant 0 : index
    %53 = vector.load %arg3[%c0_11, %c0_12] : memref<1x128xi32, #tpu.memory_space<vmem>>, vector<1x128xi32>
    tpu.vector_store %arg3[%c0_11, %c0_12], %9 {strides = array<i32>} : memref<1x128xi32, #tpu.memory_space<vmem>>, vector<1x128xi32>,
    return
  }
  func.func @transform_0(%arg0: i32) -> (i32, i32) {
    %c0_i32 = arith.constant 0 : i32
    %c0_i32_0 = arith.constant 0 : i32
    return %c0_i32, %arg0 : i32, i32
  }
  func.func @transform_1(%arg0: i32) -> (i32, i32) {
    %c0_i32 = arith.constant 0 : i32
    %c0_i32_0 = arith.constant 0 : i32
    return %c0_i32, %arg0 : i32, i32
  }
  func.func @transform_2(%arg0: i32) -> (i32, i32) {
    %c0_i32 = arith.constant 0 : i32
    %c0_i32_0 = arith.constant 0 : i32
    return %c0_i32, %arg0 : i32, i32
  }
}

</mosaic_0001>

<bundles_post_ra>
// kernel: tpu_custom_call.1
= control target key start
LH: loop header
LB: loop body
LE: loop exit
PB: predicated region body
PF: predicated region fallthrough
CT: control target
= control target key end

     0   :  { %8 = vsyncpa [#allocation3], 0  ;;  %s242_s0 = inlined_call_operand.hbm [shape: f32[8,128], index: 0, kind: input, shape index: {}]   ;;  %s243_s1 = inlined_call_operand.hbm [shape: f32[8,128], index: 1, kind: output, shape index: {0}]   ;;  %s244_s2 = inlined_call_operand.hbm [shape: s32[1,128], index: 2, kind: output, shape index: {1}]  }
   0x1   :  { %9 = vsyncpa [#allocation4], 0 }
   0x2   :  { %10 = vsyncpa [#allocation7], 0  ;;  %s185_s9 = smov [#allocation2]   ;;  %s113_s13 = scalar_lea.hbm %s242_s0, 128 }
   0x3   :  { %s17_s10 = sshll.u32 %s185_s9, 4  ;;  %p114_p0 = scmp.ne.s32.totalorder %s242_s0, %s113_s13  ;;  %s18_s10 = int_to_ptr.vmem [resolvable:$true] %s17_s10 }
   0x4   :  { %p117_p1 = scmp.lt.u32.totalorder %s113_s13, %s242_s0 }
   0x6   :  { %p119_p2 = pnand %p117_p1, %p114_p0 }
   0x8   :  { %122 = shalt.err (!%p119_p2)
}
   0x9   :  { %s123_s18 = scalar_lea.vmem %s18_s10, 128  ;;  %p128_p4 = scmp.lt.s32.totalorder %s18_s10, %s18_s10 }
   0xa   :  { %p124_p3 = scmp.ne.s32.totalorder %s18_s10, %s123_s18  ;;  %p129_p5 = scmp.lt.s32.totalorder %s123_s18, %s123_s18 }
   0xc   :  { %p130_p6 = por %p129_p5, %p128_p4 }
   0xe   :  { %p131_p7 = pnand %p130_p6, %p124_p3 }
  0x10   :  { %134 = shalt.err (!%p131_p7)
}
  0x11   :  { %20 = dma.hbm_to_vmem [thread:$0]  %s242_s0, 128, %s18_s10, [#allocation3]  }
  0x12   :  { %179 = dma.done.wait [#allocation3], 128  }
  0x13   :  { %180 = vsyncadd [#allocation3], 4294967168  ;;  %v24_v0 = vld [vmem:[#allocation2] sm:$0xff]  ;;  %v31_v4 = vlaneseq  ;;  %s186_s0 = smov [#allocation6]  }
  0x14   :  { %v25_v1 = vrot.slane %v24_v0, 4  ;;  %s97_s21 = sshll.u32 %s186_s0, 4  ;;  %v44_v15 = vrot.slane %v24_v0, 1  ;;  %v49_v16 = vrot.slane %v24_v0, 2  ;;  %v54_v18 = vrot.slane %v24_v0, 3  ;;  %s98_s21 = int_to_ptr.vmem [resolvable:$true] %s97_s21 }
  0x15   :  { %v32_v7 = vshrl.u32 %v31_v4, 7  ;;  %v64_v20 = vrot.slane %v24_v0, 5  ;;  %s135_s22 = scalar_lea.vmem %s98_s21, 16  ;;  %s139_s23 = scalar_lea.vmem %s98_s21, 32 }
  0x16   :  { %v26_v2 = vmax.f32 %v24_v0, %v25_v1  ;;  %p136_p8 = scmp.ne.s32.totalorder %s98_s21, %s135_s22  ;;  %p140_p9 = scmp.lt.s32.totalorder %s98_s21, %s98_s21 }
  0x17   :  { %p141_p10 = scmp.lt.s32.totalorder %s139_s23, %s135_s22 }
  0x18   :  { %v27_v3 = vrot.slane %v26_v2, 2 }
  0x19   :  { %p142_p11 = por %p141_p10, %p140_p9 }
  0x1a   :  { %v28_v5 = vmax.f32 %v26_v2, %v27_v3 }
  0x1b   :  { %p143_p12 = pnand %p142_p11, %p136_p8 }
  0x1c   :  { %v29_v6 = vrot.slane %v28_v5, 1 }
  0x1e   :  { %v30_v8 = vmax.f32 %v28_v5, %v29_v6 }
  0x20   :  { %vm33_vm0 = vcmp.eq.f32.partialorder %v24_v0, %v30_v8 }
  0x21   :  { %v34_v9 = vsel %vm33_vm0, %v32_v7, 8 }
  0x22   :  { %v35_v10 = vrot.slane %v34_v9, 4 }
  0x24   :  { %vm36_vm1 = vcmp.lt.s32.totalorder %v34_v9, %v35_v10 }
  0x25   :  { %v37_v11 = vsel %vm36_vm1, %v34_v9, %v35_v10 }
  0x26   :  { %v38_v12 = vrot.slane %v37_v11, 2 }
  0x28   :  { %vm39_vm2 = vcmp.lt.s32.totalorder %v37_v11, %v38_v12 }
  0x29   :  { %v40_v13 = vsel %vm39_vm2, %v37_v11, %v38_v12 }
  0x2a   :  { %v41_v14 = vrot.slane %v40_v13, 1 }
  0x2c   :  { %vm42_vm3 = vcmp.lt.s32.totalorder %v40_v13, %v41_v14 }
  0x2d   :  { %v43_v17 = vsel %vm42_vm3, %v40_v13, %v41_v14 }
  0x2e   :  { %vm45_vm4 = vcmp.eq.s32.totalorder %v43_v17, 1  ;;  %vm50_vm5 = vcmp.eq.s32.totalorder %v43_v17, 2  ;;  %vm55_vm6 = vcmp.eq.s32.totalorder %v43_v17, 3  ;;  %80 = vst [vmem:[#allocation6] sm:$0x1] %v43_v17  ;;  %vm60_vm7 = vcmp.eq.s32.totalorder %v43_v17, 4 }
  0x2f   :  { %v48_v19 = vsel %vm45_vm4, %v44_v15, %v24_v0 }
  0x30   :  { %146 = shalt.err (!%p143_p12)
}
  0x31   :  { %s147_s26 = scalar_lea.hbm %s244_s2, 16 }
  0x32   :  { %p148_p13 = scmp.ne.s32.totalorder %s244_s2, %s147_s26  ;;  %p151_p0 = scmp.lt.u32.totalorder %s147_s26, %s244_s2 }
  0x34   :  { %p153_p1 = pnand %p151_p0, %p148_p13 }
  0x36   :  { %156 = shalt.err (!%p153_p1)
}
  0x37   :  { %100 = dma.vmem_to_hbm [thread:$0]  %s98_s21, 16, %s244_s2, [#allocation7]   ;;  %v53_v21 = vsel %vm50_vm5, %v49_v16, %v48_v19  ;;  %vm65_vm8 = vcmp.eq.s32.totalorder %v43_v17, 5  ;;  %v69_v22 = vrot.slane %v24_v0, 6  ;;  %vm70_vm9 = vcmp.eq.s32.totalorder %v43_v17, 6 }
  0x38   :  { %v58_v23 = vsel %vm55_vm6, %v54_v18, %v53_v21  ;;  %v74_v24 = vrot.slane %v24_v0, 7  ;;  %s187_s5 = smov [#allocation5]   ;;  %vm75_vm10 = vcmp.eq.s32.totalorder %v43_v17, 7 }
  0x39   :  { %s87_s6 = sshll.u32 %s187_s5, 4  ;;  %v63_v25 = vsel %vm60_vm7, %v25_v1, %v58_v23  ;;  %s88_s6 = int_to_ptr.vmem [resolvable:$true] %s87_s6 }
  0x3a   :  { %v68_v26 = vsel %vm65_vm8, %v64_v20, %v63_v25  ;;  %s157_s7 = scalar_lea.vmem %s88_s6, 128  ;;  %p162_p3 = scmp.lt.s32.totalorder %s88_s6, %s88_s6 }
  0x3b   :  { %v73_v27 = vsel %vm70_vm9, %v69_v22, %v68_v26  ;;  %p158_p2 = scmp.ne.s32.totalorder %s88_s6, %s157_s7  ;;  %p163_p4 = scmp.lt.s32.totalorder %s157_s7, %s157_s7 }
  0x3c   :  { %v78_v28 = vsel %vm75_vm10, %v74_v24, %v73_v27 }
  0x3d   :  { %79 = vst [vmem:[#allocation5] sm:$0xff] %v78_v28  ;;  %p164_p5 = por %p163_p4, %p162_p3 }
  0x3f   :  { %p165_p6 = pnand %p164_p5, %p158_p2 }
  0x41   :  { %168 = shalt.err (!%p165_p6)
}
  0x42   :  { %s169_s9 = scalar_lea.hbm %s243_s1, 128 }
  0x43   :  { %p170_p7 = scmp.ne.s32.totalorder %s243_s1, %s169_s9  ;;  %p173_p8 = scmp.lt.u32.totalorder %s169_s9, %s243_s1 }
  0x45   :  { %p175_p9 = pnand %p173_p8, %p170_p7 }
  0x47   :  { %178 = shalt.err (!%p175_p9)
}
  0x48   :  { %90 = dma.vmem_to_hbm [thread:$0]  %s88_s6, 128, %s243_s1, [#allocation4]  }
  0x49   :  { %181 = dma.done.wait [#allocation4], 128  }
  0x4a   :  { %182 = vsyncadd [#allocation4], 4294967168 }
  0x4b   :  { %183 = dma.done.wait [#allocation7], 16  }
  0x4c   :  { %184 = vsyncadd [#allocation7], 4294967280 }
  0x4d   :  { %107 = vsyncpa [#allocation3], 1 }
  0x4e   :  { %108 = vsyncpa [#allocation4], 1 }
  0x4f   :  { %109 = vsyncpa [#allocation7], 1 }

</bundles_post_ra>
